<compile_context>
chip_gen: v7x
topology: tpu7x:2x2x1
jax: 0.10.0
libtpu: 0.0.40
codegen_flags: <defaults>
</compile_context>

<pallas_src>
import functools

import jax
import jax.numpy as jnp
from jax import lax
from jax.experimental import pallas as pl
from jax.experimental.pallas import tpu as pltpu


_TARGET_STEP_BYTES = 2 << 20    # ~2 MiB of each input per grid step
_INPUT_VMEM_BUDGET = 24 << 20   # 2 inputs x 2 pipeline buffers, v7x-safe


def _moco_partial_kernel(q_ref, k_ref, gram_out, qsq_out, ksq_out,
                         gram_acc, qsq_acc, ksq_acc, *,
                         d, chunks_per_part, need_mask):
    """Streams (B, td) chunks and accumulates gram / ||q||^2 / ||k||^2."""
    p = pl.program_id(0)          # parallel part (v7x: one per TensorCore)
    c = pl.program_id(1)          # feature-chunk reduction step

    @pl.when(c == 0)
    def _():
        gram_acc[...] = jnp.zeros_like(gram_acc)
        qsq_acc[...] = jnp.zeros_like(qsq_acc)
        ksq_acc[...] = jnp.zeros_like(ksq_acc)

    q = q_ref[...]                # (B, td), native dtype (bf16 goes to MXU as-is)
    k = k_ref[...]

    if need_mask:
        # Ragged tail (and any clamped redundant chunk): zero out lanes past D.
        # A few VPU ops per step, hidden under the DMA; avoids the HBM
        # round-trip a wrapper-side jnp.pad would cost.
        td = q.shape[1]
        start = (p * chunks_per_part + c) * td
        lane = lax.broadcasted_iota(jnp.int32, q.shape, 1)
        valid = (start + lane) < d
        q = jnp.where(valid, q, jnp.zeros_like(q))
        k = jnp.where(valid, k, jnp.zeros_like(k))

    # Un-normalized Gram chunk: contract the feature (lane) axis of both
    # operands directly (no k.T), accumulate in f32 on the MXU.
    gram_acc[...] += lax.dot_general(
        q, k, (((1,), (1,)), ((), ())), preferred_element_type=jnp.float32)

    # Squared L2 norms: plain VPU multiply + XLU lane reduce (different VLIW
    # slots than the MXU) — no degenerate M=1 matmul.
    qf = q.astype(jnp.float32)
    kf = k.astype(jnp.float32)
    qsq_acc[...] += jnp.sum(qf * qf, axis=-1, keepdims=True)   # (B, 1)
    ksq_acc[...] += jnp.sum(kf * kf, axis=-1, keepdims=True)   # (B, 1)

    @pl.when(c == pl.num_programs(1) - 1)
    def _():
        gram_out[0] = gram_acc[...]
        qsq_out[0] = qsq_acc[...]
        ksq_out[0] = ksq_acc[...]


def _moco_finalize_kernel(gram_ref, qsq_ref, ksq_ref, loss_ref, *, temperature):
    """Combines per-part partials, normalizes, and computes the CE loss."""
    parts = gram_ref.shape[0]
    gram = gram_ref[0]            # (B, B)
    qsq = qsq_ref[0]              # (B, 1)
    ksq = ksq_ref[0]              # (1, B)  (transposed tiny column, wrapper-side)
    for p in range(1, parts):     # static unroll over <= num_parts partials
        gram = gram + gram_ref[p]
        qsq = qsq + qsq_ref[p]
        ksq = ksq + ksq_ref[p]

    eps = jnp.float32(1e-8)
    inv_t = jnp.float32(1.0 / temperature)

    qn = jnp.sqrt(qsq)                                  # (B, 1)
    kn = jnp.sqrt(ksq)                                  # (1, B)
    # torch.nn.functional.cosine_similarity convention: clamp the *product*
    # of the norms (not each norm separately).
    denom = jnp.maximum(qn * kn, eps)                   # (B, B)
    l_neg = gram / denom * inv_t                        # cos(q_i, k_j) / T

    n = l_neg.shape[0]
    row = lax.broadcasted_iota(jnp.int32, (n, n), 0)
    col = lax.broadcasted_iota(jnp.int32, (n, n), 1)
    pos = jnp.sum(jnp.where(row == col, l_neg, 0.0), axis=-1, keepdims=True)  # l_pos/T

    # Cross-entropy vs class 0 over [l_pos, l_neg_row]; the positive is counted
    # twice in the denominator, exactly matching torch.cat((l_pos, l_neg), 1).
    m = jnp.maximum(pos, jnp.max(l_neg, axis=-1, keepdims=True))
    sum_exp = jnp.exp(pos - m) + jnp.sum(jnp.exp(l_neg - m), axis=-1, keepdims=True)
    lse = m + jnp.log(sum_exp)
    loss_ref[0, 0] = jnp.sum(lse - pos) / jnp.float32(n)


def moco_loss(feat_q, feat_k, idx=None, temperature=0.07,
              d_tile=None, num_parts=2):
    """Pallas MocoLoss.forward, queue-free path (K == 0 / use_queue=False).

    # TODO(synk): the stateful OrderedDict negative queue (idx-keyed
    # enqueue/update/dequeue across forward calls) is host-side Python state
    # with no Pallas equivalent; only the in-batch-negatives path is done.
    """
    del idx  # only used by the (untranslated) queue bookkeeping
    assert feat_q.shape == feat_k.shape, (feat_q.shape, feat_k.shape)
    b = feat_q.shape[0]
    q = feat_q.reshape(b, -1)           # (B, D) — pure reshape, no transpose
    k = feat_k.reshape(b, -1)
    d = q.shape[1]
    itemsize = q.dtype.itemsize

    # ---- adaptive feature tile -------------------------------------------
    d_ceil = pl.cdiv(d, 128) * 128
    if d_tile is None:
        td = max(_TARGET_STEP_BYTES // max(b * itemsize, 1), 128)
    else:
        td = max(int(d_tile), 128)
    td = pl.cdiv(td, 128) * 128
    td_cap = max((_INPUT_VMEM_BUDGET // (4 * b * itemsize)) // 128 * 128, 128)
    td = min(td, td_cap, d_ceil)

    n_chunks = pl.cdiv(d, td)
    parts = max(1, min(int(num_parts), n_chunks))      # v7x: 2 TCs; harmless on 1-TC chips
    nc = pl.cdiv(n_chunks, parts)                      # chunks per part
    need_mask = (parts * nc * td) != d                 # ragged tail / redundant chunk

    if parts * nc == n_chunks:
        chunk_idx = lambda p, c: (0, p * nc + c)
    else:
        last = n_chunks - 1                            # clamp redundant chunks
        chunk_idx = lambda p, c: (0, jnp.minimum(p * nc + c, last))

    # ---- VMEM budget (explicit so large td keeps double-buffering on v5e) --
    est = (4 * b * td * itemsize              # 2 inputs x 2 pipeline buffers
           + 3 * (b * b + 2 * b) * 4          # scratch accumulators
           + 2 * (b * b + 2 * b) * 4)         # output blocks
    vmem_limit = int(min(max(est * 3 // 2 + (2 << 20), 16 << 20), 62 << 20))

    kernel1 = functools.partial(
        _moco_partial_kernel, d=d, chunks_per_part=nc, need_mask=need_mask)

    gram_p, qsq_p, ksq_p = pl.pallas_call(
        kernel1,
        out_shape=(
            jax.ShapeDtypeStruct((parts, b, b), jnp.float32),
            jax.ShapeDtypeStruct((parts, b, 1), jnp.float32),
            jax.ShapeDtypeStruct((parts, b, 1), jnp.float32),
        ),
        grid_spec=pltpu.PrefetchScalarGridSpec(
            num_scalar_prefetch=0,
            grid=(parts, nc),
            in_specs=[
                pl.BlockSpec((b, td), chunk_idx),
                pl.BlockSpec((b, td), chunk_idx),
            ],
            out_specs=[
                pl.BlockSpec((1, b, b), lambda p, c: (p, 0, 0)),
                pl.BlockSpec((1, b, 1), lambda p, c: (p, 0, 0)),
                pl.BlockSpec((1, b, 1), lambda p, c: (p, 0, 0)),
            ],
            scratch_shapes=[
                pltpu.VMEM((b, b), jnp.float32),   # gram accumulator
                pltpu.VMEM((b, 1), jnp.float32),   # ||q||^2 accumulator
                pltpu.VMEM((b, 1), jnp.float32),   # ||k||^2 accumulator
            ],
        ),
        compiler_params=pltpu.CompilerParams(
            dimension_semantics=("parallel", "arbitrary"),
            vmem_limit_bytes=vmem_limit,
        ),
    )(q, k)

    # Tiny layout plumbing (not compute hoisting): present ||k||^2 as a lane
    # row so the finalize kernel needs no in-kernel transpose.
    ksq_row_p = jnp.transpose(ksq_p, (0, 2, 1))        # (parts, 1, B)

    fin_bytes = parts * (b * b + 2 * b) * 4
    fin_vmem = int(min(max(8 * fin_bytes + (4 << 20), 16 << 20), 62 << 20))

    kernel2 = functools.partial(_moco_finalize_kernel,
                                temperature=float(temperature))
    loss = pl.pallas_call(
        kernel2,
        out_shape=jax.ShapeDtypeStruct((1, 1), jnp.float32),
        grid_spec=pltpu.PrefetchScalarGridSpec(
            num_scalar_prefetch=0,
            grid=(1,),
            in_specs=[
                pl.BlockSpec((parts, b, b), lambda i: (0, 0, 0)),
                pl.BlockSpec((parts, b, 1), lambda i: (0, 0, 0)),
                pl.BlockSpec((parts, 1, b), lambda i: (0, 0, 0)),
            ],
            out_specs=pl.BlockSpec((1, 1), lambda i: (0, 0)),
        ),
        compiler_params=pltpu.CompilerParams(
            dimension_semantics=("arbitrary",),
            vmem_limit_bytes=fin_vmem,
        ),
    )(gram_p, qsq_p, ksq_row_p)
    return loss[0, 0]


def _moco_loss_ref(feat_q, feat_k, temperature=0.07):
    """Pure-JAX reference mirroring the PyTorch forward (no-queue path)."""
    b = feat_q.shape[0]
    q = feat_q.reshape(b, -1).astype(jnp.float32)
    k = feat_k.reshape(b, -1).astype(jnp.float32)
    eps = 1e-8
    qn = jnp.sqrt(jnp.sum(q * q, axis=-1))
    kn = jnp.sqrt(jnp.sum(k * k, axis=-1))
    gram = jnp.dot(q, k.T, precision=lax.Precision.HIGHEST)
    l_neg = gram / jnp.maximum(qn[:, None] * kn[None, :], eps)   # diag not masked
    l_pos = jnp.diagonal(l_neg)[:, None]
    out = jnp.concatenate([l_pos, l_neg], axis=1) / temperature
    lse = jax.scipy.special.logsumexp(out, axis=1)
    return jnp.mean(lse - out[:, 0])


if __name__ == "__main__":
    key = jax.random.PRNGKey(0)
    k1, k2, k3, k4, k5, k6 = jax.random.split(key, 6)

    # 1) Canonical module shapes: B=2, C(dim)=4, H=W=16 -> D=1024, f32.
    fq = jax.random.normal(k1, (2, 4, 16, 16), jnp.float32)
    fk = jax.random.normal(k2, (2, 4, 16, 16), jnp.float32)
    idx = jnp.arange(2, dtype=jnp.int32)
    loss = moco_loss(fq, fk, idx)
    jax.block_until_ready(loss)
    ref = _moco_loss_ref(fq, fk)
    assert jnp.allclose(loss, ref, rtol=1e-3, atol=1e-3), (loss, ref)

    # 2) Ragged D (1100, not a multiple of the 256 tile) with several chunks:
    #    exercises the in-kernel tail mask, the clamped redundant chunk and the
    #    2-part parallel split of the D reduction.
    fq = jax.random.normal(k3, (8, 11, 10, 10), jnp.float32)
    fk = jax.random.normal(k4, (8, 11, 10, 10), jnp.float32)
    loss = moco_loss(fq, fk, None, d_tile=256)
    jax.block_until_ready(loss)
    ref = _moco_loss_ref(fq, fk)
    assert jnp.allclose(loss, ref, rtol=1e-3, atol=1e-3), (loss, ref)

    # 3) bf16 features: native bf16 MXU path (f32 accumulate), halved HBM traffic.
    fq = jax.random.normal(k5, (4, 4, 8, 8), jnp.bfloat16)
    fk = jax.random.normal(k6, (4, 4, 8, 8), jnp.bfloat16)
    loss = moco_loss(fq, fk, None)
    jax.block_until_ready(loss)
    ref = _moco_loss_ref(fq, fk)
    assert jnp.allclose(loss, ref, rtol=3e-2, atol=3e-2), (loss, ref)

    print("KERNEL_OK")
</pallas_src>

<mosaic_0001>
module attributes {stable_mosaic.version = 11 : i64} {
  func.func @_moco_partial_kernel(%arg0: i32, %arg1: i32, %arg2: memref<2x1024xf32, #tpu.memory_space<vmem>>, %arg3: memref<2x1024xf32, #tpu.memory_space<vmem>>, %arg4: memref<1x2x2xf32, #tpu.memory_space<vmem>>, %arg5: memref<1x2x1xf32, #tpu.memory_space<vmem>>, %arg6: memref<1x2x1xf32, #tpu.memory_space<vmem>>, %arg7: memref<2x2xf32, #tpu.memory_space<vmem>>, %arg8: memref<2x1xf32, #tpu.memory_space<vmem>>, %arg9: memref<2x1xf32, #tpu.memory_space<vmem>>) attributes {dimension_semantics = [#tpu.dimension_semantics<parallel>, #tpu.dimension_semantics<arbitrary>], iteration_bounds = array<i64: 1, 1>, scalar_prefetch = 0 : i64, scratch_operands = 3 : i64, tpu.core_type = #tpu.core_type<tc>, window_params = [{transform_indices = @transform_0, window_bounds = array<i64: 2, 1024>}, {transform_indices = @transform_1, window_bounds = array<i64: 2, 1024>}, {transform_indices = @transform_2, window_bounds = array<i64: 1, 2, 2>}, {transform_indices = @transform_3, window_bounds = array<i64: 1, 2, 1>}, {transform_indices = @transform_4, window_bounds = array<i64: 1, 2, 1>}]} {
    %c0_i32 = arith.constant 0 : i32
    %0 = arith.cmpi eq, %arg1, %c0_i32 : i32
    %1 = arith.extui %0 : i1 to i32
    %c0_i32_0 = arith.constant 0 : i32
    %2 = arith.cmpi ne, %1, %c0_i32_0 : i32
    scf.if %2 {
      %cst_20 = arith.constant 0.000000e+00 : f32
      %24 = vector.broadcast %cst_20 : f32 to vector<2x2xf32>
      %c0_21 = arith.constant 0 : index
      %c0_22 = arith.constant 0 : index
      %25 = vector.load %arg7[%c0_21, %c0_22] : memref<2x2xf32, #tpu.memory_space<vmem>>, vector<2x2xf32>
      tpu.vector_store %arg7[%c0_21, %c0_22], %24 {strides = array<i32>} : memref<2x2xf32, #tpu.memory_space<vmem>>, vector<2x2xf32>,
      %cst_23 = arith.constant 0.000000e+00 : f32
      %26 = vector.broadcast %cst_23 : f32 to vector<2x1xf32>
      %c0_24 = arith.constant 0 : index
      %c0_25 = arith.constant 0 : index
      %27 = vector.load %arg8[%c0_24, %c0_25] : memref<2x1xf32, #tpu.memory_space<vmem>>, vector<2x1xf32>
      tpu.vector_store %arg8[%c0_24, %c0_25], %26 {strides = array<i32>} : memref<2x1xf32, #tpu.memory_space<vmem>>, vector<2x1xf32>,
      %cst_26 = arith.constant 0.000000e+00 : f32
      %28 = vector.broadcast %cst_26 : f32 to vector<2x1xf32>
      %c0_27 = arith.constant 0 : index
      %c0_28 = arith.constant 0 : index
      %29 = vector.load %arg9[%c0_27, %c0_28] : memref<2x1xf32, #tpu.memory_space<vmem>>, vector<2x1xf32>
      tpu.vector_store %arg9[%c0_27, %c0_28], %28 {strides = array<i32>} : memref<2x1xf32, #tpu.memory_space<vmem>>, vector<2x1xf32>,
    } else {
    }
    %c0 = arith.constant 0 : index
    %c0_1 = arith.constant 0 : index
    %3 = vector.load %arg2[%c0, %c0_1] : memref<2x1024xf32, #tpu.memory_space<vmem>>, vector<2x1024xf32>
    %c0_2 = arith.constant 0 : index
    %c0_3 = arith.constant 0 : index
    %4 = vector.load %arg3[%c0_2, %c0_3] : memref<2x1024xf32, #tpu.memory_space<vmem>>, vector<2x1024xf32>
    %c0_4 = arith.constant 0 : index
    %c0_5 = arith.constant 0 : index
    %5 = vector.load %arg7[%c0_4, %c0_5] : memref<2x2xf32, #tpu.memory_space<vmem>>, vector<2x2xf32>
    %cst = arith.constant dense<0.000000e+00> : vector<2x2xf32>
    %6 = tpu.matmul %3, %4, %cst {dimension_numbers = #tpu.dot_dimension_numbers<[1], [1], [0], [0], [0, 0, 1, 0], [], []>} : vector<2x1024xf32>, vector<2x1024xf32>, vector<2x2xf32> -> vector<2x2xf32>
    %7 = arith.addf %5, %6 : vector<2x2xf32>
    %c0_6 = arith.constant 0 : index
    %c0_7 = arith.constant 0 : index
    %8 = vector.load %arg7[%c0_6, %c0_7] : memref<2x2xf32, #tpu.memory_space<vmem>>, vector<2x2xf32>
    tpu.vector_store %arg7[%c0_6, %c0_7], %7 {strides = array<i32>} : memref<2x2xf32, #tpu.memory_space<vmem>>, vector<2x2xf32>,
    %c0_8 = arith.constant 0 : index
    %c0_9 = arith.constant 0 : index
    %9 = vector.load %arg8[%c0_8, %c0_9] : memref<2x1xf32, #tpu.memory_space<vmem>>, vector<2x1xf32>
    %10 = arith.mulf %3, %3 : vector<2x1024xf32>
    %cst_10 = arith.constant dense<0.000000e+00> : vector<2xf32>
    %11 = vector.multi_reduction <add>, %10, %cst_10 [1] : vector<2x1024xf32> to vector<2xf32>
    %12 = vector.shape_cast %11 : vector<2xf32> to vector<2x1xf32>
    %13 = arith.addf %9, %12 : vector<2x1xf32>
    %c0_11 = arith.constant 0 : index
    %c0_12 = arith.constant 0 : index
    %14 = vector.load %arg8[%c0_11, %c0_12] : memref<2x1xf32, #tpu.memory_space<vmem>>, vector<2x1xf32>
    tpu.vector_store %arg8[%c0_11, %c0_12], %13 {strides = array<i32>} : memref<2x1xf32, #tpu.memory_space<vmem>>, vector<2x1xf32>,
    %c0_13 = arith.constant 0 : index
    %c0_14 = arith.constant 0 : index
    %15 = vector.load %arg9[%c0_13, %c0_14] : memref<2x1xf32, #tpu.memory_space<vmem>>, vector<2x1xf32>
    %16 = arith.mulf %4, %4 : vector<2x1024xf32>
    %cst_15 = arith.constant dense<0.000000e+00> : vector<2xf32>
    %17 = vector.multi_reduction <add>, %16, %cst_15 [1] : vector<2x1024xf32> to vector<2xf32>
    %18 = vector.shape_cast %17 : vector<2xf32> to vector<2x1xf32>
    %19 = arith.addf %15, %18 : vector<2x1xf32>
    %c0_16 = arith.constant 0 : index
    %c0_17 = arith.constant 0 : index
    %20 = vector.load %arg9[%c0_16, %c0_17] : memref<2x1xf32, #tpu.memory_space<vmem>>, vector<2x1xf32>
    tpu.vector_store %arg9[%c0_16, %c0_17], %19 {strides = array<i32>} : memref<2x1xf32, #tpu.memory_space<vmem>>, vector<2x1xf32>,
    %c0_i32_18 = arith.constant 0 : i32
    %21 = arith.cmpi eq, %arg1, %c0_i32_18 : i32
    %22 = arith.extui %21 : i1 to i32
    %c0_i32_19 = arith.constant 0 : i32
    %23 = arith.cmpi ne, %22, %c0_i32_19 : i32
    scf.if %23 {
      %c0_20 = arith.constant 0 : index
      %c0_21 = arith.constant 0 : index
      %24 = vector.load %arg7[%c0_20, %c0_21] : memref<2x2xf32, #tpu.memory_space<vmem>>, vector<2x2xf32>
      %c0_22 = arith.constant 0 : index
      %c0_23 = arith.constant 0 : index
      %c0_24 = arith.constant 0 : index
      %25 = vector.load %arg4[%c0_22, %c0_23, %c0_24] : memref<1x2x2xf32, #tpu.memory_space<vmem>>, vector<1x2x2xf32>
      %26 = vector.shape_cast %25 : vector<1x2x2xf32> to vector<2x2xf32>
      %27 = vector.shape_cast %24 : vector<2x2xf32> to vector<1x2x2xf32>
      tpu.vector_store %arg4[%c0_22, %c0_23, %c0_24], %27 {strides = array<i32>} : memref<1x2x2xf32, #tpu.memory_space<vmem>>, vector<1x2x2xf32>,
      %c0_25 = arith.constant 0 : index
      %c0_26 = arith.constant 0 : index
      %28 = vector.load %arg8[%c0_25, %c0_26] : memref<2x1xf32, #tpu.memory_space<vmem>>, vector<2x1xf32>
      %c0_27 = arith.constant 0 : index
      %c0_28 = arith.constant 0 : index
      %c0_29 = arith.constant 0 : index
      %29 = vector.load %arg5[%c0_27, %c0_28, %c0_29] : memref<1x2x1xf32, #tpu.memory_space<vmem>>, vector<1x2x1xf32>
      %30 = vector.shape_cast %29 : vector<1x2x1xf32> to vector<2x1xf32>
      %31 = vector.shape_cast %28 : vector<2x1xf32> to vector<1x2x1xf32>
      tpu.vector_store %arg5[%c0_27, %c0_28, %c0_29], %31 {strides = array<i32>} : memref<1x2x1xf32, #tpu.memory_space<vmem>>, vector<1x2x1xf32>,
      %c0_30 = arith.constant 0 : index
      %c0_31 = arith.constant 0 : index
      %32 = vector.load %arg9[%c0_30, %c0_31] : memref<2x1xf32, #tpu.memory_space<vmem>>, vector<2x1xf32>
      %c0_32 = arith.constant 0 : index
      %c0_33 = arith.constant 0 : index
      %c0_34 = arith.constant 0 : index
      %33 = vector.load %arg6[%c0_32, %c0_33, %c0_34] : memref<1x2x1xf32, #tpu.memory_space<vmem>>, vector<1x2x1xf32>
      %34 = vector.shape_cast %33 : vector<1x2x1xf32> to vector<2x1xf32>
      %35 = vector.shape_cast %32 : vector<2x1xf32> to vector<1x2x1xf32>
      tpu.vector_store %arg6[%c0_32, %c0_33, %c0_34], %35 {strides = array<i32>} : memref<1x2x1xf32, #tpu.memory_space<vmem>>, vector<1x2x1xf32>,
    } else {
    }
    return
  }
  func.func @transform_0(%arg0: i32, %arg1: i32) -> (i32, i32) {
    %c1_i32 = arith.constant 1 : i32
    %0 = arith.muli %arg0, %c1_i32 : i32
    %1 = arith.addi %0, %arg1 : i32
    %c0_i32 = arith.constant 0 : i32
    %c0_i32_0 = arith.constant 0 : i32
    return %c0_i32, %1 : i32, i32
  }
  func.func @transform_1(%arg0: i32, %arg1: i32) -> (i32, i32) {
    %c1_i32 = arith.constant 1 : i32
    %0 = arith.muli %arg0, %c1_i32 : i32
    %1 = arith.addi %0, %arg1 : i32
    %c0_i32 = arith.constant 0 : i32
    %c0_i32_0 = arith.constant 0 : i32
    return %c0_i32, %1 : i32, i32
  }
  func.func @transform_2(%arg0: i32, %arg1: i32) -> (i32, i32, i32) {
    %c0_i32 = arith.constant 0 : i32
    %c0_i32_0 = arith.constant 0 : i32
    %c0_i32_1 = arith.constant 0 : i32
    return %arg0, %c0_i32, %c0_i32_0 : i32, i32, i32
  }
  func.func @transform_3(%arg0: i32, %arg1: i32) -> (i32, i32, i32) {
    %c0_i32 = arith.constant 0 : i32
    %c0_i32_0 = arith.constant 0 : i32
    %c0_i32_1 = arith.constant 0 : i32
    return %arg0, %c0_i32, %c0_i32_0 : i32, i32, i32
  }
  func.func @transform_4(%arg0: i32, %arg1: i32) -> (i32, i32, i32) {
    %c0_i32 = arith.constant 0 : i32
    %c0_i32_0 = arith.constant 0 : i32
    %c0_i32_1 = arith.constant 0 : i32
    return %arg0, %c0_i32, %c0_i32_0 : i32, i32, i32
  }
}

</mosaic_0001>

<bundles_post_ra>
// kernel: tpu_custom_call.1
= control target key start
LH: loop header
LB: loop body
LE: loop exit
PB: predicated region body
PF: predicated region fallthrough
CT: control target
= control target key end

     0   :  { %10 = vsyncpa [#allocation6], 0  ;;  %s799_s0 = inlined_call_operand.hbm [shape: f32[2,1024], index: 0, kind: input, shape index: {}]   ;;  %s800_s1 = inlined_call_operand.hbm [shape: f32[2,1024], index: 1, kind: input, shape index: {}]   ;;  %s801_s2 = inlined_call_operand.hbm [shape: f32[1,2,2], index: 2, kind: output, shape index: {0}]   ;;  %s802_s3 = inlined_call_operand.vmem [shape: f32[1,2,1], index: 3, kind: output, shape index: {1}]   ;;  %s803_s4 = inlined_call_operand.vmem [shape: f32[1,2,1], index: 4, kind: output, shape index: {2}]  }
   0x1   :  { %11 = vsyncpa [#allocation9], 0 }
   0x2   :  { %12 = vsyncpa [#allocation7], 0  ;;  %s684_s15 = smov [#allocation5]   ;;  %s685_s17 = smov [#allocation8]  }
   0x3   :  { %s23_s16 = sshll.u32 %s684_s15, 4  ;;  %s37_s18 = sshll.u32 %s685_s17, 4  ;;  %s24_s16 = int_to_ptr.vmem [resolvable:$true] %s23_s16  ;;  %s38_s18 = int_to_ptr.vmem [resolvable:$true] %s37_s18 }
   0x4   :  { %s612_s21 = scalar_lea.hbm %s799_s0, 256 }
   0x5   :  { %p613_p0 = scmp.ne.s32.totalorder %s799_s0, %s612_s21  ;;  %p616_p1 = scmp.lt.u32.totalorder %s612_s21, %s799_s0 }
   0x7   :  { %p618_p2 = pnand %p616_p1, %p613_p0 }
   0x9   :  { %621 = shalt.err (!%p618_p2)
}
   0xa   :  { %s622_s26 = scalar_lea.vmem %s24_s16, 256  ;;  %p627_p4 = scmp.lt.s32.totalorder %s24_s16, %s24_s16 }
   0xb   :  { %p623_p3 = scmp.ne.s32.totalorder %s24_s16, %s622_s26  ;;  %p628_p5 = scmp.lt.s32.totalorder %s622_s26, %s622_s26 }
   0xd   :  { %p629_p6 = por %p628_p5, %p627_p4 }
   0xf   :  { %p630_p7 = pnand %p629_p6, %p623_p3 }
  0x11   :  { %633 = shalt.err (!%p630_p7)
}
  0x12   :  { %26 = dma.hbm_to_vmem [thread:$0]  %s799_s0, 256, %s24_s16, [#allocation6]  }
  0x13   :  { %s634_s5 = scalar_lea.hbm %s800_s1, 256 }
  0x14   :  { %p635_p8 = scmp.ne.s32.totalorder %s800_s1, %s634_s5  ;;  %p638_p9 = scmp.lt.u32.totalorder %s634_s5, %s800_s1 }
  0x16   :  { %p640_p10 = pnand %p638_p9, %p635_p8 }
  0x18   :  { %643 = shalt.err (!%p640_p10)
}
  0x19   :  { %s644_s10 = scalar_lea.vmem %s38_s18, 256  ;;  %p649_p12 = scmp.lt.s32.totalorder %s38_s18, %s38_s18 }
  0x1a   :  { %p645_p11 = scmp.ne.s32.totalorder %s38_s18, %s644_s10  ;;  %p650_p13 = scmp.lt.s32.totalorder %s644_s10, %s644_s10 }
  0x1c   :  { %p651_p0 = por %p650_p13, %p649_p12 }
  0x1e   :  { %p652_p1 = pnand %p651_p0, %p645_p11 }
  0x20   :  { %655 = shalt.err (!%p652_p1)
}
  0x21   :  { %40 = dma.hbm_to_vmem [thread:$0]  %s800_s1, 256, %s38_s18, [#allocation9]  }
  0x22   :  { %678 = dma.done.wait [#allocation6], 256  }
  0x23   :  { %679 = vsyncadd [#allocation6], 4294967040 }
  0x24   :  { %680 = dma.done.wait [#allocation9], 256  }
  0x25   :  { %681 = vsyncadd [#allocation9], 4294967040  ;;  %v71_v0 = vlaneseq  ;;  %v686_v1 = vmov 1983009808   ;;  %v62_v6 = vld [vmem:[#allocation8] sm:$0xff]  ;;  %vm483_vm0 = vcmask 1041408  }
  0x26   :  { %v69_v2 = vunpack.c.l.s4 %v686_v1  ;;  %v60_v7 = vld [vmem:[#allocation5] sm:$0xff]  ;;  %v63_v8 = vld [vmem:[#allocation8 + $0x8] sm:$0xff]  ;;  %v505_v10 = vmul.f32 %v62_v6, %v62_v6  ;;  %v111_v11 = vcombine.high %v62_v6, %v62_v6  ;;  %v61_v25 = vld [vmem:[#allocation5 + $0x8] sm:$0xff]  ;;  %vm57_vm1 = vcmask 1024  }
  0x27   :  { %v72_v3 = vshrl.u32 %v71_v0, 7  ;;  %v437_v13 = vmul.f32 %v60_v7, %v60_v7  ;;  %v67_v15 = vcombine.high %v60_v7, %v60_v7  ;;  %v128_v16 = vcombine.high %v63_v8, %v63_v8 }
  0x28   :  { %v70_v4 = vunpack.c.0.s8 %v69_v2  ;;  %v509_v18 = vcombine.high %v505_v10, %v505_v10  ;;  %v84_v37 = vcombine.high %v61_v25, %v61_v25  ;;  %v438_v41 = vmul.f32 %v61_v25, %v61_v25 }
  0x29   :  { %v441_v22 = vcombine.high %v437_v13, %v437_v13  ;;  %v506_v52 = vmul.f32 %v63_v8, %v63_v8  ;;  %vm55_vm2 = vcmask 9216  }
  0x2a   :  { %v738_v5 = vsub.s32 %v70_v4, %v72_v3  ;;  %v458_v47 = vcombine.high %v438_v41, %v438_v41 }
  0x2b   :  { %v526_v60 = vcombine.high %v506_v52, %v506_v52 }
  0x2c   :  { %v118_v9 = vrot.slane %v62_v6, %v738_v5  ;;  %v74_v12 = vrot.slane %v60_v7, %v738_v5  ;;  %v135_v14 = vrot.slane %v63_v8, %v738_v5  ;;  %v516_v19 = vrot.slane %v505_v10, %v738_v5 }
  0x2d   :  { %v125_v20 = vrot.slane %v111_v11, %v738_v5  ;;  %v448_v23 = vrot.slane %v437_v13, %v738_v5  ;;  %v523_v26 = vrot.slane %v509_v18, %v738_v5  ;;  %v455_v30 = vrot.slane %v441_v22, %v738_v5 }
  0x2e   :  { %v126_v17 = vcombine.high %v118_v9, %v118_v9  ;;  %v82_v21 = vcombine.high %v74_v12, %v74_v12  ;;  %v143_v24 = vcombine.high %v135_v14, %v135_v14  ;;  %v524_v27 = vcombine.high %v516_v19, %v516_v19 }
  0x2f   :  { %v551_v28 = vsel %vm483_vm0, %v516_v19, 0.0  ;;  %v127_v29 = vcombine.high %v125_v20, %v125_v20  ;;  %v456_v31 = vcombine.high %v448_v23, %v448_v23  ;;  %v484_v32 = vsel %vm483_vm0, %v448_v23, 0.0 }
  0x30   :  { %153 = vmatprep.subr.mxu0 %v126_v17  ;;  %217 = vmatprep.mubr.f32.mxu0 %v82_v21  ;;  %v81_v33 = vrot.slane %v67_v15, %v738_v5  ;;  %v552_v34 = vsel %vm483_vm0, %v524_v27, 0.0  ;;  %v142_v35 = vrot.slane %v128_v16, %v738_v5  ;;  %v91_v36 = vrot.slane %v61_v25, %v738_v5 }
  0x31   :  { %154 = vmatpush1.xpose.msra.mxu0 %v118_v9  ;;  %223 = vmatprep.subr.mxu1 %v127_v29  ;;  %v553_v38 = vadd.f32 %v552_v34, %v551_v28  ;;  %v485_v39 = vsel %vm483_vm0, %v456_v31, 0.0  ;;  %v98_v45 = vrot.slane %v84_v37, %v738_v5  ;;  %v457_v46 = vcombine.high %v455_v30, %v455_v30 }
  0x32   :  { %293 = vmatprep.subr.mxu0 %v143_v24  ;;  %224 = vmatpush1.xpose.msra.mxu1 %v125_v20  ;;  %v83_v40 = vcombine.high %v81_v33, %v81_v33  ;;  %v486_v42 = vadd.f32 %v485_v39, %v484_v32  ;;  %v144_v43 = vcombine.high %v142_v35, %v142_v35  ;;  %v487_v49 = vsel %vm483_vm0, %v455_v30, 0.0 }
  0x33   :  { %v99_v44 = vcombine.high %v91_v36, %v91_v36  ;;  %v465_v48 = vrot.slane %v438_v41, %v738_v5  ;;  %v100_v50 = vcombine.high %v98_v45, %v98_v45  ;;  %v554_v53 = vsel %vm483_vm0, %v523_v26, 0.0 }
  0x34   :  { %218 = vmatmul.mubr.f32.vlgmr.msra.gmra.mrb[0].mxu0 %v74_v12  ;;  %287 = vmatprep.mubr.f32.mxu1 %v83_v40  ;;  %v488_v51 = vadd.f32 %v487_v49, %v486_v42  ;;  %v472_v54 = vrot.slane %v458_v47, %v738_v5  ;;  %v489_v56 = vsel %vm483_vm0, %v457_v46, 0.0  ;;  %v525_v59 = vcombine.high %v523_v26, %v523_v26 }
  0x35   :  { %294 = vmatpush1.xpose.msra.mxu0 %v135_v14  ;;  %288 = vmatmul.mubr.f32.vlgmr.msra.gmra.mrb[0].mxu1 %v81_v33  ;;  %v473_v55 = vcombine.high %v465_v48, %v465_v48  ;;  %v491_v57 = vsel %vm483_vm0, %v465_v48, 0.0  ;;  %v533_v63 = vrot.slane %v506_v52, %v738_v5  ;;  %v540_v1 = vrot.slane %v526_v60, %v738_v5 }
  0x36   :  { %363 = vmatprep.subr.mxu1 %v144_v43  ;;  %357 = vmatprep.mubr.f32.mxu0 %v99_v44  ;;  %v490_v58 = vadd.f32 %v489_v56, %v488_v51  ;;  %v474_v61 = vcombine.high %v472_v54, %v472_v54  ;;  %v555_v2 = vadd.f32 %v554_v53, %v553_v38  ;;  %v556_v3 = vsel %vm483_vm0, %v525_v59, 0.0 }
  0x37   :  { %364 = vmatpush1.xpose.msra.mxu1 %v142_v35  ;;  %427 = vmatprep.mubr.f32.mxu1 %v100_v50  ;;  %v493_v62 = vsel %vm483_vm0, %v473_v55, 0.0  ;;  %v495_v4 = vsel %vm483_vm0, %v472_v54, 0.0  ;;  %v541_v6 = vcombine.high %v533_v63, %v533_v63  ;;  %v558_v7 = vsel %vm483_vm0, %v533_v63, 0.0 }
  0x38   :  { %358 = vmatmul.mubr.f32.vlgmr.msra.gmra.mrb[2].mxu0 %v91_v36  ;;  %v492_v0 = vadd.f32 %v491_v57, %v490_v58  ;;  %v557_v9 = vadd.f32 %v556_v3, %v555_v2  ;;  %v497_v10 = vsel %vm483_vm0, %v474_v61, 0.0  ;;  %v542_v11 = vcombine.high %v540_v1, %v540_v1 }
  0x39   :  { %v560_v12 = vsel %vm483_vm0, %v541_v6, 0.0  ;;  %v562_v15 = vsel %vm483_vm0, %v540_v1, 0.0  ;;  %v687_v20 = vmov 0.0  }
  0x3a   :  { %428 = vmatmul.mubr.f32.vlgmr.msra.gmra.mrb[2].mxu1 %v98_v45  ;;  %v494_v8 = vadd.f32 %v493_v62, %v492_v0  ;;  %v559_v14 = vadd.f32 %v558_v7, %v557_v9  ;;  %v564_v17 = vsel %vm483_vm0, %v542_v11, 0.0  ;;  %58 = vst.msk [vmem:[#allocation3] sm:$0x3] %vm57_vm1, %v687_v20  ;;  %59 = vst.msk [vmem:[#allocation4] sm:$0x3] %vm57_vm1, %v687_v20 }
  0x3b   :  { %56 = vst.msk [vmem:[#allocation2] sm:$0x3] %vm55_vm2, %v687_v20 }
  0x3c   :  { %v496_v13 = vadd.f32 %v495_v4, %v494_v8  ;;  %v561_v16 = vadd.f32 %v560_v12, %v559_v14 }
  0x3e   :  { %v498_v5 = vadd.f32 %v497_v10, %v496_v13  ;;  %v563_v18 = vadd.f32 %v562_v15, %v561_v16 }
  0x40   :  { %499 = vadd.xlane.f32.xlu0 %v498_v5  ;;  %v565_v19 = vadd.f32 %v564_v17, %v563_v18 }
  0x41   :  { %v436_v21 = vld [vmem:[#allocation3] sm:$0x3]  ;;  %v504_v24 = vld [vmem:[#allocation4] sm:$0x3] }
  0x42   :  { %v64_v37 = vld [vmem:[#allocation2] sm:$0x3] }
  0x44   :  { %566 = vadd.xlane.f32.xlu0 %v565_v19 }
  0xcd   :  { %v500_v22 = vpop.xlane.xlu0 %499 }
  0xce   :  { %v501_v23 = vadd.f32 %v500_v22, %v436_v21 }
  0xd0   :  { %503 = vst.msk [vmem:[#allocation3] sm:$0x3] %vm57_vm1, %v501_v23 }
  0xd1   :  { %v567_v25 = vpop.xlane.xlu0 %566 }
  0xd2   :  { %v568_v26 = vadd.f32 %v567_v25, %v504_v24 }
  0xd4   :  { %569 = vst.msk [vmem:[#allocation4] sm:$0x3] %vm57_vm1, %v568_v26 }
  0xd7   :  { %v575_v27 = vld [vmem:[#allocation3] sm:$0x3] }
  0xd8   :  { %576 = vst.msk [vmem:[%s802_s3] sm:$0x3] %vm57_vm1, %v575_v27  ;;  %s688_s3 = smov [#allocation10]  }
  0xd9   :  { %s585_s15 = sshll.u32 %s688_s3, 4  ;;  %s586_s15 = int_to_ptr.vmem [resolvable:$true] %s585_s15 }
  0xda   :  { %p661_p3 = scmp.lt.s32.totalorder %s586_s15, %s586_s15 }
  0xdb   :  { %v577_v28 = vld [vmem:[#allocation4] sm:$0x3] }
  0xdc   :  { %578 = vst.msk [vmem:[%s803_s4] sm:$0x3] %vm57_vm1, %v577_v28  ;;  %s656_s4 = scalar_lea.vmem %s586_s15, 32 }
  0xdd   :  { %p657_p2 = scmp.ne.s32.totalorder %s586_s15, %s656_s4  ;;  %p662_p4 = scmp.lt.s32.totalorder %s656_s4, %s656_s4 }
  0xdf   :  { %p663_p5 = por %p662_p4, %p661_p3 }
  0xe1   :  { %p664_p6 = pnand %p663_p5, %p657_p2 }
 0x107   :  { %v219_v29 = vpop.f32.mrb[0].mxu0 }
 0x108   :  { %v221_v30 = vpop.f32.mrb[1].mxu0  ;;  %v289_v31 = vpop.f32.mrb[0].mxu1 }
 0x109   :  { %v290_v32 = vadd.f32 %v289_v31, %v219_v29  ;;  %v291_v33 = vpop.f32.mrb[1].mxu1 }
 0x10b   :  { %v359_v34 = vpop.f32.mrb[2].mxu0 }
 0x10c   :  { %v360_v35 = vadd.f32 %v359_v34, %v290_v32  ;;  %v361_v36 = vpop.f32.mrb[3].mxu0 }
 0x10d   :  { %v429_v38 = vpop.f32.mrb[2].mxu1 }
 0x10e   :  { %v430_v39 = vadd.f32 %v429_v38, %v360_v35  ;;  %v431_v40 = vpop.f32.mrb[3].mxu1 }
 0x110   :  { %v433_v41 = vadd.f32 %v430_v39, %v64_v37 }
 0x112   :  { %435 = vst.msk [vmem:[#allocation2] sm:$0x3] %vm55_vm2, %v433_v41 }
 0x119   :  { %v573_v42 = vld [vmem:[#allocation2] sm:$0x3] }
 0x11a   :  { %574 = vst.msk [vmem:[#allocation10] sm:$0x3] %vm55_vm2, %v573_v42 }
 0x11b   :  { %667 = shalt.err (!%p664_p6)
}
 0x11c   :  { %s668_s18 = scalar_lea.hbm %s801_s2, 32 }
 0x11d   :  { %p669_p7 = scmp.ne.s32.totalorder %s801_s2, %s668_s18  ;;  %p672_p8 = scmp.lt.u32.totalorder %s668_s18, %s801_s2 }
 0x11f   :  { %p674_p9 = pnand %p672_p8, %p669_p7 }
 0x121   :  { %677 = shalt.err (!%p674_p9)
}
 0x122   :  { %588 = dma.vmem_to_hbm [thread:$0]  %s586_s15, 32, %s801_s2, [#allocation7]  }
 0x123   :  { %682 = dma.done.wait [#allocation7], 32  }
 0x124   :  { %683 = vsyncadd [#allocation7], 4294967264 }
 0x125   :  { %600 = vsyncpa [#allocation6], 1 }
 0x126   :  { %601 = vsyncpa [#allocation9], 1 }
 0x127   :  { %602 = vsyncpa [#allocation7], 1 }

</bundles_post_ra>
